<compile_context>
chip_gen: v5e
topology: v5e:2x2
jax: 0.10.0
libtpu: 0.0.40
codegen_flags: <defaults>
</compile_context>

<pallas_src>
import functools

import jax
import jax.numpy as jnp
from jax import lax
from jax.experimental import pallas as pl
from jax.experimental.pallas import tpu as pltpu


def _round_up(x, m):
    return (x + m - 1) // m * m


def _generator_kernel(x_ref, w_ref, b_ref, o_ref, m_ref, l_ref, *, vocab, tn):
    # x_ref: (tm, d_model)   compute dtype (bf16 by default)
    # w_ref: (tn, d_model)   compute dtype (nn.Linear layout tile, NOT transposed)
    # b_ref: (1, tn)         f32
    # o_ref: (tm, tn)        out dtype
    # m_ref/l_ref: (tm, 1)   f32 running max / running sum-exp
    p = pl.program_id(1)  # 0 = statistics pass, 1 = write pass
    j = pl.program_id(2)  # vocab tile index

    # logits tile in f32, transposed-RHS contraction on the MXU.
    logits = lax.dot_general(
        x_ref[...],
        w_ref[...],
        dimension_numbers=(((1,), (1,)), ((), ())),
        preferred_element_type=jnp.float32,
    )
    logits = logits + b_ref[...].astype(jnp.float32)

    # Mask padded vocab lanes of the last tile with -inf so they cannot
    # corrupt the max / sum-exp reductions (or the written log-probs).
    if vocab % tn != 0:
        col = j * tn + lax.broadcasted_iota(jnp.int32, (1, tn), 1)
        logits = jnp.where(col < vocab, logits, -jnp.inf)

    @pl.when(jnp.logical_and(p == 0, j == 0))
    def _init():
        m_ref[...] = jnp.full_like(m_ref, -jnp.inf)
        l_ref[...] = jnp.zeros_like(l_ref)

    @pl.when(p == 0)
    def _accumulate():
        m_prev = m_ref[...]
        m_new = jnp.maximum(m_prev, jnp.max(logits, axis=-1, keepdims=True))
        l_ref[...] = l_ref[...] * jnp.exp(m_prev - m_new) + jnp.sum(
            jnp.exp(logits - m_new), axis=-1, keepdims=True
        )
        m_ref[...] = m_new

    @pl.when(p == 1)
    def _write():
        lse = m_ref[...] + jnp.log(l_ref[...])
        o_ref[...] = (logits - lse).astype(o_ref.dtype)


@functools.partial(
    jax.jit, static_argnames=("tm", "tn", "compute_dtype", "out_dtype")
)
def generator_forward(
    x,
    weight,
    bias,
    *,
    tm=256,
    tn=2048,
    compute_dtype=jnp.bfloat16,
    out_dtype=None,
):
    """log_softmax(x @ weight.T + bias, axis=-1)

    x:      [batch, seq, d_model]
    weight: [vocab, d_model]   (nn.Linear convention, not pre-transposed)
    bias:   [vocab]
    returns [batch, seq, vocab] in `out_dtype` (default: x.dtype).
    """
    batch, seq, d_model = x.shape
    vocab = weight.shape[0]
    rows = batch * seq
    out_dtype = x.dtype if out_dtype is None else out_dtype

    # Clamp tiles to (rounded-up) problem size so tiny problems stay legal
    # and large ones get MXU-sized tiles.
    tm_eff = min(tm, _round_up(rows, 8))
    tn_eff = min(tn, _round_up(vocab, 128))

    x2 = x.reshape(rows, d_model).astype(compute_dtype)
    w = weight.astype(compute_dtype)          # [vocab, d_model], no transpose
    b2 = bias.reshape(1, vocab).astype(jnp.float32)

    grid_rows = pl.cdiv(rows, tm_eff)
    grid_vocab = pl.cdiv(vocab, tn_eff)

    # VMEM budget from the actual tile footprint (double-buffered pipelined
    # blocks + f32 logits temp + lane-padded scratch), with 2x headroom,
    # clamped to stay within v7x's 64 MiB physical VMEM.
    cbytes = jnp.dtype(compute_dtype).itemsize
    obytes = jnp.dtype(out_dtype).itemsize
    tn_pad = _round_up(tn_eff, 128)
    footprint = (
        2 * tm_eff * d_model * cbytes          # x tile
        + 2 * tn_eff * d_model * cbytes        # weight tile
        + 2 * 8 * tn_pad * 4                   # bias tile (sublane-padded)
        + 2 * tm_eff * tn_pad * obytes         # output tile
        + tm_eff * tn_pad * 4                  # f32 logits temporary
        + 2 * tm_eff * 128 * 4                 # m / l scratch (lane-padded)
    )
    vmem_limit = int(min(max(2 * footprint, 32 * 1024 * 1024), 64 * 1024 * 1024))

    kernel = functools.partial(_generator_kernel, vocab=vocab, tn=tn_eff)

    out2 = pl.pallas_call(
        kernel,
        out_shape=jax.ShapeDtypeStruct((rows, vocab), out_dtype),
        grid_spec=pltpu.PrefetchScalarGridSpec(
            num_scalar_prefetch=0,
            grid=(grid_rows, 2, grid_vocab),   # (row tiles, phase, vocab tiles)
            in_specs=[
                pl.BlockSpec((tm_eff, d_model), lambda i, p, j: (i, 0)),
                pl.BlockSpec((tn_eff, d_model), lambda i, p, j: (j, 0)),
                pl.BlockSpec((1, tn_eff), lambda i, p, j: (0, j)),
            ],
            # During phase 0 the output block index is pinned to (i, 0) so no
            # un-normalized block is ever written back to HBM; phase 1 walks
            # (i, j) and emits the final log-probs exactly once per block.
            out_specs=pl.BlockSpec((tm_eff, tn_eff), lambda i, p, j: (i, j * p)),
            scratch_shapes=[
                pltpu.VMEM((tm_eff, 1), jnp.float32),   # running max
                pltpu.VMEM((tm_eff, 1), jnp.float32),   # running sum-exp
            ],
        ),
        compiler_params=pltpu.CompilerParams(
            dimension_semantics=("parallel", "arbitrary", "arbitrary"),
            vmem_limit_bytes=vmem_limit,
        ),
    )(x2, w, b2)

    return out2.reshape(batch, seq, vocab)


if __name__ == "__main__":
    # Small shapes implied by the module: x [batch, seq, d_model] -> [batch, seq, vocab]
    # vocab=200 is deliberately NOT a multiple of 128 to exercise tail masking.
    batch, seq, d_model, vocab = 2, 8, 32, 200

    key = jax.random.PRNGKey(0)
    kx, kw, kb = jax.random.split(key, 3)

    # nn.Linear-style uniform(-1/sqrt(fan_in), 1/sqrt(fan_in)) init.
    bound = 1.0 / (d_model ** 0.5)
    weight = jax.random.uniform(kw, (vocab, d_model), jnp.float32, -bound, bound)
    bias = jax.random.uniform(kb, (vocab,), jnp.float32, -bound, bound)
    x = jax.random.normal(kx, (batch, seq, d_model), jnp.float32)

    ref = jax.nn.log_softmax(jnp.einsum("bsd,vd->bsv", x, weight) + bias, axis=-1)

    # 1) f32 compute path with tiny tiles: exercises multiple row tiles,
    #    multiple vocab tiles, the two-pass online log-softmax, and the
    #    ragged-vocab mask. Tight tolerance.
    out_f32 = generator_forward(
        x, weight, bias, tm=8, tn=128, compute_dtype=jnp.float32
    )
    jax.block_until_ready(out_f32)
    assert out_f32.shape == (batch, seq, vocab)
    assert jnp.allclose(out_f32, ref, atol=1e-4, rtol=1e-4)

    # 2) Default fast path: bf16 matmul operands, f32 accumulation & softmax,
    #    f32 output. Looser tolerance for the bf16 input rounding.
    out_fast = generator_forward(x, weight, bias)
    jax.block_until_ready(out_fast)
    assert out_fast.shape == (batch, seq, vocab)
    assert jnp.allclose(out_fast, ref, atol=1e-1, rtol=5e-2)

    print("KERNEL_OK")
</pallas_src>

<mosaic_0001>
module attributes {stable_mosaic.version = 11 : i64} {
  func.func @_generator_kernel(%arg0: i32, %arg1: i32, %arg2: i32, %arg3: memref<8x32xf32, #tpu.memory_space<vmem>>, %arg4: memref<128x32xf32, #tpu.memory_space<vmem>>, %arg5: memref<1x128xf32, #tpu.memory_space<vmem>>, %arg6: memref<8x128xf32, #tpu.memory_space<vmem>>, %arg7: memref<8x1xf32, #tpu.memory_space<vmem>>, %arg8: memref<8x1xf32, #tpu.memory_space<vmem>>) attributes {dimension_semantics = [#tpu.dimension_semantics<parallel>, #tpu.dimension_semantics<arbitrary>, #tpu.dimension_semantics<arbitrary>], iteration_bounds = array<i64: 2, 2, 2>, scalar_prefetch = 0 : i64, scratch_operands = 2 : i64, tpu.core_type = #tpu.core_type<tc>, window_params = [{transform_indices = @transform_0, window_bounds = array<i64: 8, 32>}, {transform_indices = @transform_1, window_bounds = array<i64: 128, 32>}, {transform_indices = @transform_2, window_bounds = array<i64: 1, 128>}, {transform_indices = @transform_3, window_bounds = array<i64: 8, 128>}]} {
    %c0 = arith.constant 0 : index
    %c0_0 = arith.constant 0 : index
    %0 = vector.load %arg3[%c0, %c0_0] : memref<8x32xf32, #tpu.memory_space<vmem>>, vector<8x32xf32>
    %c0_1 = arith.constant 0 : index
    %c0_2 = arith.constant 0 : index
    %1 = vector.load %arg4[%c0_1, %c0_2] : memref<128x32xf32, #tpu.memory_space<vmem>>, vector<128x32xf32>
    %cst = arith.constant dense<0.000000e+00> : vector<8x128xf32>
    %2 = tpu.matmul %0, %1, %cst {dimension_numbers = #tpu.dot_dimension_numbers<[1], [1], [0], [0], [0, 0, 1, 0], [], []>} : vector<8x32xf32>, vector<128x32xf32>, vector<8x128xf32> -> vector<8x128xf32>
    %c0_3 = arith.constant 0 : index
    %c0_4 = arith.constant 0 : index
    %3 = vector.load %arg5[%c0_3, %c0_4] : memref<1x128xf32, #tpu.memory_space<vmem>>, vector<1x128xf32>
    %4 = vector.broadcast %3 : vector<1x128xf32> to vector<8x128xf32>
    %5 = arith.addf %2, %4 : vector<8x128xf32>
    %c128_i32 = arith.constant 128 : i32
    %6 = arith.muli %arg2, %c128_i32 : i32
    %7 = tpu.iota {dimensions = array<i32: 1>} : vector<1x128xi32>
    %8 = vector.broadcast %6 : i32 to vector<1x128xi32>
    %9 = arith.addi %8, %7 : vector<1x128xi32>
    %c200_i32 = arith.constant 200 : i32
    %10 = vector.broadcast %c200_i32 : i32 to vector<1x128xi32>
    %11 = arith.cmpi slt, %9, %10 : vector<1x128xi32>
    %cst_5 = arith.constant 0xFF800000 : f32
    %12 = vector.shape_cast %11 : vector<1x128xi1> to vector<1x128xi1>
    %13 = vector.broadcast %12 : vector<1x128xi1> to vector<8x128xi1>
    %14 = vector.broadcast %cst_5 : f32 to vector<8x128xf32>
    %15 = arith.select %13, %5, %14 : vector<8x128xi1>, vector<8x128xf32>
    %c0_i32 = arith.constant 0 : i32
    %16 = arith.cmpi eq, %arg1, %c0_i32 : i32
    %c0_i32_6 = arith.constant 0 : i32
    %17 = arith.cmpi eq, %arg2, %c0_i32_6 : i32
    %18 = arith.andi %16, %17 : i1
    %19 = arith.extui %18 : i1 to i32
    %c0_i32_7 = arith.constant 0 : i32
    %20 = arith.cmpi ne, %19, %c0_i32_7 : i32
    scf.if %20 {
      %cst_11 = arith.constant 0xFF800000 : f32
      %27 = vector.broadcast %cst_11 : f32 to vector<8x1xf32>
      %c0_12 = arith.constant 0 : index
      %c0_13 = arith.constant 0 : index
      %28 = vector.load %arg7[%c0_12, %c0_13] : memref<8x1xf32, #tpu.memory_space<vmem>>, vector<8x1xf32>
      tpu.vector_store %arg7[%c0_12, %c0_13], %27 {strides = array<i32>} : memref<8x1xf32, #tpu.memory_space<vmem>>, vector<8x1xf32>,
      %cst_14 = arith.constant 0.000000e+00 : f32
      %29 = vector.broadcast %cst_14 : f32 to vector<8x1xf32>
      %c0_15 = arith.constant 0 : index
      %c0_16 = arith.constant 0 : index
      %30 = vector.load %arg8[%c0_15, %c0_16] : memref<8x1xf32, #tpu.memory_space<vmem>>, vector<8x1xf32>
      tpu.vector_store %arg8[%c0_15, %c0_16], %29 {strides = array<i32>} : memref<8x1xf32, #tpu.memory_space<vmem>>, vector<8x1xf32>,
    } else {
    }
    %c0_i32_8 = arith.constant 0 : i32
    %21 = arith.cmpi eq, %arg1, %c0_i32_8 : i32
    %22 = arith.extui %21 : i1 to i32
    %c0_i32_9 = arith.constant 0 : i32
    %23 = arith.cmpi ne, %22, %c0_i32_9 : i32
    scf.if %23 {
      %c0_11 = arith.constant 0 : index
      %c0_12 = arith.constant 0 : index
      %27 = vector.load %arg7[%c0_11, %c0_12] : memref<8x1xf32, #tpu.memory_space<vmem>>, vector<8x1xf32>
      %cst_13 = arith.constant dense<0xFF800000> : vector<8xf32>
      %28 = vector.multi_reduction <maximumf>, %15, %cst_13 [1] : vector<8x128xf32> to vector<8xf32>
      %29 = vector.shape_cast %28 : vector<8xf32> to vector<8x1xf32>
      %30 = arith.maximumf %27, %29 : vector<8x1xf32>
      %c0_14 = arith.constant 0 : index
      %c0_15 = arith.constant 0 : index
      %31 = vector.load %arg8[%c0_14, %c0_15] : memref<8x1xf32, #tpu.memory_space<vmem>>, vector<8x1xf32>
      %32 = arith.subf %27, %30 : vector<8x1xf32>
      %33 = math.exp %32 : vector<8x1xf32>
      %34 = arith.mulf %31, %33 : vector<8x1xf32>
      %35 = vector.broadcast %30 : vector<8x1xf32> to vector<8x128xf32>
      %36 = arith.subf %15, %35 : vector<8x128xf32>
      %37 = math.exp %36 : vector<8x128xf32>
      %cst_16 = arith.constant dense<0.000000e+00> : vector<8xf32>
      %38 = vector.multi_reduction <add>, %37, %cst_16 [1] : vector<8x128xf32> to vector<8xf32>
      %39 = vector.shape_cast %38 : vector<8xf32> to vector<8x1xf32>
      %40 = arith.addf %34, %39 : vector<8x1xf32>
      %c0_17 = arith.constant 0 : index
      %c0_18 = arith.constant 0 : index
      %41 = vector.load %arg8[%c0_17, %c0_18] : memref<8x1xf32, #tpu.memory_space<vmem>>, vector<8x1xf32>
      tpu.vector_store %arg8[%c0_17, %c0_18], %40 {strides = array<i32>} : memref<8x1xf32, #tpu.memory_space<vmem>>, vector<8x1xf32>,
      %c0_19 = arith.constant 0 : index
      %c0_20 = arith.constant 0 : index
      %42 = vector.load %arg7[%c0_19, %c0_20] : memref<8x1xf32, #tpu.memory_space<vmem>>, vector<8x1xf32>
      tpu.vector_store %arg7[%c0_19, %c0_20], %30 {strides = array<i32>} : memref<8x1xf32, #tpu.memory_space<vmem>>, vector<8x1xf32>,
    } else {
    }
    %c1_i32 = arith.constant 1 : i32
    %24 = arith.cmpi eq, %arg1, %c1_i32 : i32
    %25 = arith.extui %24 : i1 to i32
    %c0_i32_10 = arith.constant 0 : i32
    %26 = arith.cmpi ne, %25, %c0_i32_10 : i32
    scf.if %26 {
      %c0_11 = arith.constant 0 : index
      %c0_12 = arith.constant 0 : index
      %27 = vector.load %arg7[%c0_11, %c0_12] : memref<8x1xf32, #tpu.memory_space<vmem>>, vector<8x1xf32>
      %c0_13 = arith.constant 0 : index
      %c0_14 = arith.constant 0 : index
      %28 = vector.load %arg8[%c0_13, %c0_14] : memref<8x1xf32, #tpu.memory_space<vmem>>, vector<8x1xf32>
      %29 = math.log %28 : vector<8x1xf32>
      %30 = arith.addf %27, %29 : vector<8x1xf32>
      %31 = vector.broadcast %30 : vector<8x1xf32> to vector<8x128xf32>
      %32 = arith.subf %15, %31 : vector<8x128xf32>
      %c0_15 = arith.constant 0 : index
      %c0_16 = arith.constant 0 : index
      %33 = vector.load %arg6[%c0_15, %c0_16] : memref<8x128xf32, #tpu.memory_space<vmem>>, vector<8x128xf32>
      tpu.vector_store %arg6[%c0_15, %c0_16], %32 {strides = array<i32>} : memref<8x128xf32, #tpu.memory_space<vmem>>, vector<8x128xf32>,
    } else {
    }
    return
  }
  func.func @transform_0(%arg0: i32, %arg1: i32, %arg2: i32) -> (i32, i32) {
    %c0_i32 = arith.constant 0 : i32
    %c0_i32_0 = arith.constant 0 : i32
    return %arg0, %c0_i32 : i32, i32
  }
  func.func @transform_1(%arg0: i32, %arg1: i32, %arg2: i32) -> (i32, i32) {
    %c0_i32 = arith.constant 0 : i32
    %c0_i32_0 = arith.constant 0 : i32
    return %arg2, %c0_i32 : i32, i32
  }
  func.func @transform_2(%arg0: i32, %arg1: i32, %arg2: i32) -> (i32, i32) {
    %c0_i32 = arith.constant 0 : i32
    %c0_i32_0 = arith.constant 0 : i32
    return %c0_i32, %arg2 : i32, i32
  }
  func.func @transform_3(%arg0: i32, %arg1: i32, %arg2: i32) -> (i32, i32) {
    %0 = arith.muli %arg2, %arg1 : i32
    %c0_i32 = arith.constant 0 : i32
    return %arg0, %0 : i32, i32
  }
}

</mosaic_0001>

<bundles_post_ra>
// kernel: generator_forward.1
= control target key start
LH: loop header
LB: loop body
LE: loop exit
PB: predicated region body
PF: predicated region fallthrough
CT: control target
= control target key end

     0   :  { %s1000_s0 = inlined_call_operand.vmem [shape: f32[16,32], index: 0, kind: input, shape index: {}]   ;;  %s1001_s1 = inlined_call_operand.vmem [shape: f32[200,32], index: 1, kind: input, shape index: {}]   ;;  %s1002_s2 = inlined_call_operand.vmem [shape: f32[1,200], index: 2, kind: input, shape index: {}]   ;;  %s1003_s3 = inlined_call_operand.hbm [shape: f32[16,200], index: 3, kind: output, shape index: {}]  }
   0x1   :  { %1006 = sst [smem:[#allocation8_spill]] %s1000_s0 }
   0x2   :  { %1007 = sst [smem:[#allocation9_spill]] %s1001_s1 }
   0x3   :  { %1008 = sst [smem:[#allocation10_spill]] %s1002_s2 }
   0x4   :  { %8 = vsyncpa [#allocation5], 0 }
   0x5   :  { %10 = vsyncpa [#allocation5 + $0x1], 0  ;;  %s787_s12 = smov 0   ;;  %s789_s13 = smov 0  }
   0x6   :  { %s791_s14 = smov 0   ;;  %s793_s15 = smov 0  }
   0x7   :  { %s795_s16 = smov 0   ;;  %s797_s17 = smov 0  }
   0x8   :  { %s799_s18 = smov 0   ;;  %s801_s19 = smov 0  }
   0x9   :  { %s803_s20 = smov 0   ;;  %s805_s21 = smov 0  }
   0xa LB: > { %s517_s22 = sadd.s32 4294967295, %s761_s21   ;;  %s518_s23 = sadd.s32 4294967294, %s761_s21   ;;  %s761_s21 = sphi %s805_s21, %s16_s21   ;;  %s757_s20 = sphi %s803_s20, %s1025_s20   ;;  %s753_s19 = sphi %s801_s19, %s1024_s19   ;;  %s749_s18 = sphi %s799_s18, %s1023_s18   ;;  %s745_s17 = sphi %s797_s17, %s1022_s17   ;;  %s741_s16 = sphi %s795_s16, %s1021_s16   ;;  %s737_s15 = sphi %s793_s15, %s1020_s15   ;;  %s733_s14 = sphi %s791_s14, %s1019_s14   ;;  %s729_s13 = sphi %s789_s13, %s1018_s13   ;;  %s725_s12 = sphi %s787_s12, %s1017_s12  }
   0xb   : > { %s28_s24 = sadd.s32 1, %s749_s18  ;;  %s31_s25 = sadd.s32 1, %s753_s19 }
   0xc   : > { %p29_p0 = scmp.ge.s32.totalorder %s28_s24, 2  ;;  %s35_s26 = sadd.s32 1, %s757_s20 }
   0xd   : > { %s117_s27 = smul.u32 %s749_s18, %s753_s19  ;;  %p134_p1 = scmp.ne.s32.totalorder %s733_s14, %s729_s13 }
   0xe   : > { %s1027_s24 = smov (%p29_p0, %s28_s24), 0  ;;  %s1029_s25 = smov (!%p29_p0, %s31_s25), %s753_s19 }
   0xf   : > { %p135_p2 = scmp.eq.s32.totalorder %s517_s22, 7  ;;  %p33_p3 = scmp.ge.s32.totalorder %s1029_s25, 2 }
  0x10   : > { %p140_p4 = scmp.ne.s32.totalorder %s729_s13, %s725_s12  ;;  %p141_p6 = scmp.eq.s32.totalorder %s518_s23, 7 }
  0x11   : > { %p851_p5 = por %p135_p2, %p134_p1  ;;  %s1031_s25 = smov (%p33_p3, %s1029_s25), 0 }
  0x12   : > { %s1033_s26 = smov (!%p33_p3, %s35_s26), %s757_s20  ;;  %s118_s29 = smul.u32 %s1031_s25, %s1027_s24 }
  0x13   : > { %p860_p7 = por %p141_p6, %p140_p4  ;;  %p37_p8 = scmp.ge.s32.totalorder %s1033_s26, 2 }
  0x14   : > { %p521_p9 = scmp.ge.s32.totalorder %s761_s21, 1  ;;  %s120_s4 = ssub.s32 %s117_s27, %s118_s29 }
  0x15   : > { %p189_p10 = scmp.lt.s32.totalorder %s761_s21, 9  ;;  %s1035_s26 = smov (%p37_p8, %s1033_s26), 0 }
  0x16   : > { %1011 = sst [smem:[#allocation7_spill]] %s1035_s26  ;;  %s119_s5 = ssub.s32 %s757_s20, %s1035_s26 }
  0x17   : > { %p190_p11 = pnand %p521_p9, %p189_p10  ;;  %s121_s6 = sor.u32 %s120_s4, %s119_s5 }
  0x18   : > { %s124_s7 = sadd.s32 1, %s733_s14  ;;  %p122_p12 = scmp.eq.s32.totalorder %s121_s6, 0 }
  0x19   : > { %193 = sbr.rel (%p190_p11) target bundleno = 757 (0x2f5), region = 32  ;;  %s1004_s9 = sand.u32 (!%p190_p11), 1, %s729_s13  }
  0x1a   : > { %s872_s8 = scalar_select %p122_p12, %s733_s14, %s124_s7  }
  0x1b   : > { %s524_s10 = sshll.u32 (!%p190_p11), %s737_s15, 4  ;;  %s878_s11 = sshll.u32 (!%p190_p11), %s1004_s9, 3 }
  0x1c   : > { %p233_p13 = scmp.lt.s32.totalorder (!%p190_p11), %s524_s10, 24  ;;  %p242_p0 = scmp.lt.s32.totalorder (!%p190_p11), %s737_s15, 1 }
  0x1d   : > { %s1012_s1 = sld [smem:[#allocation9_spill]] (!%p190_p11)  ;;  %p224_p1 = scmp.lt.s32.totalorder (!%p190_p11), %s745_s17, 1 }
  0x1e   : > { %s1037_s10 = smov (!%p233_p13, %s524_s10), 24  ;;  %vm267_vm0 = vcmask 261120   ;;  %s1013_s2 = sld [smem:[#allocation10_spill]]  ;;  %v340_v17 = vlaneseq }
  0x1f   : > { %s525_s22 = sshll.u32 %s1037_s10, 3  ;;  %s1014_s0 = sld [smem:[#allocation8_spill]] }
  0x20   : > { %s889_s4 = scalar_select %p242_p0, %s737_s15, 1  ;;  %v341_v18 = vand.u32 127, %v340_v17 }
  0x21   : > { %s225_s10 = scalar_select %p224_p1, %s745_s17, 1 }
  0x22   : > { %p348_p2 = scmp.eq.s32.totalorder %s741_s16, 0  ;;  %p349_p3 = scmp.eq.s32.totalorder %s737_s15, 0 }
  0x23   : > { %s884_s29 = scalar_lea.vmem %s1012_s1, %s525_s22  ;;  %s523_s22 = sshll.u32 %s225_s10, 3 }
  0x24   : > { %v262_v0 = vld [vmem:[%s884_s29 + $0x78] sm:$0xff]  ;;  %v261_v1 = vld [vmem:[%s884_s29 + $0x70] sm:$0xff]  ;;  %s244_s7 = scalar_lea.vmem %s1013_s2, %s889_s4  ;;  %v260_v2 = vld [vmem:[%s884_s29 + $0x68] sm:$0xff]  ;;  %p350_p4 = pnand %p349_p3, %p348_p2 }
  0x25   : > { %526 = vmatpush.xpose.msk.msra.mxu0 %vm267_vm0, %v262_v0  ;;  %v259_v3 = vld [vmem:[%s884_s29 + $0x60] sm:$0xff]  ;;  %v258_v4 = vld [vmem:[%s884_s29 + $0x58] sm:$0xff]  ;;  %v257_v5 = vld [vmem:[%s884_s29 + $0x50] sm:$0xff]  ;;  %s227_s5 = scalar_lea.vmem %s1014_s0, %s523_s22  ;;  %s543_s6 = sshll.u32 %s737_s15, 7 }
  0x26   : > { %v256_v6 = vld [vmem:[%s884_s29 + $0x48] sm:$0xff]  ;;  %v255_v7 = vld [vmem:[%s884_s29 + $0x40] sm:$0xff]  ;;  %v254_v8 = vld [vmem:[%s884_s29 + $0x38] sm:$0xff]  ;;  %v342_v19 = vstv %s543_s6  ;;  %s223_s22 = scalar_lea.vmem [#allocation4], %s878_s11 }
  0x27   : > { %v253_v9 = vld [vmem:[%s884_s29 + $0x30] sm:$0xff]  ;;  %v252_v10 = vld [vmem:[%s884_s29 + $0x28] sm:$0xff]  ;;  %v251_v11 = vld [vmem:[%s884_s29 + $0x20] sm:$0xff]  ;;  %v343_v20 = vadd.s32 %v342_v19, %v341_v18 }
  0x28   : > { %v250_v12 = vld [vmem:[%s884_s29 + $0x18] sm:$0xff]  ;;  %v249_v13 = vld [vmem:[%s884_s29 + $0x10] sm:$0xff]  ;;  %v248_v14 = vld [vmem:[%s884_s29 + $0x8] sm:$0xff] }
  0x29   : > { %527 = vmatpush.xpose.msk.msra.mxu0 %vm267_vm0, %v261_v1  ;;  %v247_v15 = vld [vmem:[%s884_s29] sm:$0xff]  ;;  %vm344_vm1 = vcmp.lt.s32.totalorder %v343_v20, 200 }
  0x2a   : > { %v246_v16 = vld [vmem:[%s227_s5] sm:$0xff] }
  0x2b   : > { %v642_v21 = vld [vmem:[%s244_s7] ss:$0 sm:$0xff] }
  0x2d   : > { %528 = vmatpush.xpose.msk.msra.mxu0 %vm267_vm0, %v260_v2 }
  0x31   : > { %529 = vmatpush.xpose.msk.msra.mxu0 %vm267_vm0, %v259_v3 }
  0x35   : > { %530 = vmatpush.xpose.msk.msra.mxu0 %vm267_vm0, %v258_v4 }
  0x39   : > { %531 = vmatpush.xpose.msk.msra.mxu0 %vm267_vm0, %v257_v5 }
  0x3d   : > { %532 = vmatpush.xpose.msk.msra.mxu0 %vm267_vm0, %v256_v6 }
  0x41   : > { %533 = vmatpush.xpose.msk.msra.mxu0 %vm267_vm0, %v255_v7 }
  0x45   : > { %534 = vmatpush.xpose.msk.msra.mxu0 %vm267_vm0, %v254_v8 }
  0x49   : > { %535 = vmatpush.xpose.msk.msra.mxu0 %vm267_vm0, %v253_v9 }
  0x4d   : > { %536 = vmatpush.xpose.msk.msra.mxu0 %vm267_vm0, %v252_v10 }
  0x51   : > { %537 = vmatpush.xpose.msk.msra.mxu0 %vm267_vm0, %v251_v11 }
  0x55   : > { %538 = vmatpush.xpose.msk.msra.mxu0 %vm267_vm0, %v250_v12 }
  0x59   : > { %539 = vmatpush.xpose.msk.msra.mxu0 %vm267_vm0, %v249_v13 }
  0x5d   : > { %540 = vmatpush.xpose.msk.msra.mxu0 %vm267_vm0, %v248_v14 }
  0x61   : > { %541 = vmatpush.xpose.msk.msra.mxu0 %vm267_vm0, %v247_v15 }
  0x64   : > { %542 = vmatmul.msk.f32.vlgmr.msra.gmra.mxu0 %vm267_vm0, %v246_v16 }
  0xe0   : > { %353 = sbr.rel (%p350_p4) target bundleno = 232 (0xe8), region = 36 }
  0xe1   : > { %v336_v22 = vpop.f32.mrf.mxu0 }
  0xe2   : > { %v337_v23 = vadd.f32 %v642_v21, %v336_v22 }
  0xe4   : > { %v347_v24 = vsel %vm344_vm1, %v337_v23, -inf }
  0xe5   : > { %vm354_vm2 = vcmask 7168   ;;  %v763_v25 = vmov -inf   ;;  %v764_v26 = vmov 0.0  }
  0xe6   : > { %355 = vst.msk [vmem:[#allocation2] sm:$0xff] %vm354_vm2, %v763_v25 }
  0xe7   : > { %356 = vst.msk [vmem:[#allocation3] sm:$0xff] %vm354_vm2, %v764_v26 }
  0xe8 PF: > { %p544_p6 = scmp.ne.s32.totalorder %s741_s16, 0 }
  0xea   : > { %359 = sbr.rel (%p544_p6) target bundleno = 602 (0x25a), region = 40 }
  0xef   : > { %361 = vmax.xlane.f32.xlu0 %v347_v24  ;;  %v765_v27 = vmov 0   ;;  %v360_v28 = vld [vmem:[#allocation2] sm:$0xff]  ;;  %vm380_vm3 = vcmask 7168   ;;  %v364_v38 = vld [vmem:[#allocation3] sm:$0xff] }
  0xf0   : > { %643 = vset.pattern.permute.xlu0 %v765_v27 }
 0x162   : > { %v362_v29 = vpop.xlane.xlu0 %361 }
 0x163   : > { %v363_v30 = vmax.f32 %v360_v28, %v362_v29 }
 0x165   : > { %v365_v31 = vsub.f32 %v360_v28, %v363_v30  ;;  %382 = vst.msk [vmem:[#allocation2] sm:$0xff] %vm380_vm3, %v363_v30  ;;  %371 = vperm.xlu0 %643, %v363_v30  }
 0x167   : > { %v366_v36 = vmul.f32 1.442695, %v365_v31 }
 0x1d7   : > { %v372_v32 = vpop.permute.xlu0 %371 }
 0x1d8   : > { %v374_v33 = vsub.f32 %v347_v24, %v372_v32 }
 0x1da   : > { %v375_v34 = vmul.f32 1.442695, %v374_v33 }
 0x1dc   : > { %644 = vpow2.f32 %v375_v34 }
 0x1dd   : > { %646 = vpow2.f32 %v366_v36 }
 0x1e2   : > { %v645_v35 = vpop.eup %644 }
 0x1e3   : > { %377 = vadd.xlane.f32.xlu1 %v645_v35  ;;  %v647_v37 = vpop.eup %646 }
 0x1e4   : > { %v368_v39 = vmul.f32 %v647_v37, %v364_v38 }
 0x256   : > { %v378_v40 = vpop.xlane.xlu1 %377 }
 0x257   : > { %v379_v41 = vadd.f32 %v378_v40, %v368_v39 }
 0x259   : > { %381 = vst.msk [vmem:[#allocation3] sm:$0xff] %vm380_vm3, %v379_v41 }
 0x25a PF: > { %p545_p8 = scmp.ne.s32.totalorder %s741_s16, 1 }
 0x25c   : > { %386 = sbr.rel (%p545_p8) target bundleno = 739 (0x2e3), region = 44 }
 0x261   : > { %v388_v42 = vld [vmem:[#allocation3] sm:$0xff]  ;;  %v766_v43 = vmov 0   ;;  %v387_v45 = vld [vmem:[#allocation2] sm:$0xff] }
 0x262   : > { %648 = vset.pattern.permute.xlu0 %v766_v43  ;;  %649 = vlog2.f32 %v388_v42 }
 0x268   : > { %v650_v44 = vpop.eup %649 }
 0x269   : > { %v390_v46 = vmul.f32 0.6931472, %v650_v44 }
 0x26b   : > { %v391_v47 = vadd.f32 %v390_v46, %v387_v45 }
 0x26d   : > { %394 = vperm.xlu0 %648, %v391_v47  }
 0x2df   : > { %v395_v48 = vpop.permute.xlu0 %394 }
 0x2e0   : > { %v397_v49 = vsub.f32 %v347_v24, %v395_v48 }
 0x2e2   : > { %398 = vst [vmem:[%s223_s22] sm:$0xff] %v397_v49 }
 0x2e3 PF: > { %s407_s4 = smul.u32 %s737_s15, %s741_s16  ;;  %s547_s7 = sshll.u32 %s745_s17, 1 }
 0x2e4   : > { %s415_s23 = sshll.u32 %s223_s22, 4  ;;  %s1015_s0 = sand.u32 1, %s729_s13   ;;  %s416_s23 = int_to_ptr.vmem [resolvable:$true] %s415_s23 }
 0x2e5   : > { %s411_s27 = sadd.s32 %s547_s7, %s407_s4  ;;  %s400_s1 = scalar_lea.sflag [#allocation5], %s1015_s0 }
 0x2e6   : > { %s548_s5 = sshll.u32 %s411_s27, 3  ;;  %s671_s17 = scalar_lea.hbm %s1003_s3, 32 }
 0x2e7   : > { %s413_s29 = scalar_lea.hbm %s1003_s3, %s548_s5 }
 0x2e8   : > { %s417_s9 = sshll.u32 %s413_s29, 4  ;;  %s418_s9 = int_to_ptr.hbm [resolvable:$true] %s417_s9 }
 0x2e9   : > { %s665_s2 = sshra.s32 %s418_s9, 4  ;;  %s666_s2 = int_to_ptr.hbm [resolvable:$true] %s665_s2 }
 0x2ea   : > { %s667_s26 = scalar_lea.hbm %s666_s2, 8  ;;  %p672_p12 = scmp.lt.s32.totalorder %s666_s2, %s1003_s3 }
 0x2eb   : > { %p668_p9 = scmp.ne.s32.totalorder %s666_s2, %s667_s26  ;;  %p673_p13 = scmp.lt.s32.totalorder %s671_s17, %s667_s26 }
 0x2ed   : > { %p669_p10 = pnand %p668_p9, %p851_p5  ;;  %p674_p0 = por %p673_p13, %p672_p12 }
 0x2ef   : > { %p670_p11 = pneg %p669_p10 }
 0x2f1   : > { %p675_p1 = pnand %p674_p0, %p670_p11 }
 0x2f3   : > { %678 = shalt.err (!%p675_p1)
}
 0x2f4   : > { %551 = dma.vmem_to_hbm [thread:$0]  (%p851_p5), %s416_s23, 128, %s418_s9, %s400_s1  }
 0x2f5 PF: > { %p557_p2 = scmp.ge.s32.totalorder %s761_s21, 2  ;;  %s429_s0 = sand.u32 1, %s725_s12  }
 0x2f6   : > { %s430_s4 = scalar_lea.sflag [#allocation5], %s429_s0 }
 0x2f7   : > { %p554_p3 = pnand %p557_p2, %p860_p7 }
 0x2f9   : > { %p555_p4 = pneg %p554_p3 }
 0x2fb   : > { %720 = dma.done.wait (%p555_p4), %s430_s4, 128  }
 0x2fc   : > { %722 = vsyncadd (%p555_p4), %s430_s4, 4294967168  ;;  %s16_s21 = sadd.s32 1, %s761_s21   ;;  %s1016_s1 = sld [smem:[#allocation7_spill]] }
 0x2fd   : > { %p13_p6 = scmp.ge.s32.totalorder %s16_s21, 10   ;;  %s1017_s12 = smov %s729_s13 }
 0x2fe   : > { %s1018_s13 = smov %s733_s14  ;;  %s1019_s14 = smov %s872_s8 }
 0x2ff   : > { %s1020_s15 = smov %s749_s18  ;;  %s1021_s16 = smov %s753_s19 }
 0x300   : > { %s1022_s17 = smov %s757_s20  ;;  %s1023_s18 = smov %s1027_s24 }
 0x301   : > { %s1024_s19 = smov %s1031_s25  ;;  %15 = sbr.rel (!%p13_p6) target bundleno = 10 (0xa), region = 85 }
 0x302   : > { %s1025_s20 = smov %s1016_s1 }
 0x306   :  { %436 = vsyncpa [#allocation5], 1 }
 0x307   :  { %438 = vsyncpa [#allocation5 + $0x1], 1 }

</bundles_post_ra>
